<compile_context>
chip_gen: v7x
topology: tpu7x:2x2x1
jax: 0.10.0
libtpu: 0.0.40
codegen_flags: <defaults>
</compile_context>

<pallas_src>
import jax
import jax.numpy as jnp
from jax import lax
from jax.experimental import pallas as pl
from jax.experimental.pallas import tpu as pltpu


def _round_up(x, m):
    return (x + m - 1) // m * m


def label_embed_kernel(lbl_ref, emb_ref, o_ref):
    """lbl_ref: (tb, 1) int32 labels block in VMEM
       emb_ref: (V, dim) embedding table in VMEM (resident; constant index_map)
       o_ref:   (tb, dim) output block
    """
    tb = o_ref.shape[0]
    V = emb_ref.shape[0]
    lbl = lbl_ref[...]                                     # (tb, 1) int32
    col = lax.broadcasted_iota(jnp.int32, (tb, V), 1)      # (tb, V) int32
    # int32 compare -> select into the table dtype (v5e-friendly: no bf16 VPU
    # arithmetic needed, the MXU accumulates in f32 regardless).
    onehot = (col == lbl).astype(emb_ref.dtype)            # exactly one 1 per valid row
    o_ref[...] = jnp.dot(
        onehot, emb_ref[...],
        preferred_element_type=jnp.float32,
        precision=lax.Precision.HIGHEST,                   # keep f32 rows bit-faithful
    ).astype(o_ref.dtype)


def _make_specs(V, dim, tb, single_buffer_table):
    table_kwargs = {}
    if single_buffer_table:
        # Table never changes across grid steps -> one VMEM copy is enough.
        table_kwargs = dict(pipeline_mode=pl.Buffered(1))
    in_specs = [
        pl.BlockSpec((tb, 1), lambda i: (i, 0)),            # labels block
        pl.BlockSpec((V, dim), lambda i: (0, 0), **table_kwargs),  # resident table
    ]
    out_specs = pl.BlockSpec((tb, dim), lambda i: (i, 0))
    return in_specs, out_specs


def label_embed(labels, emb_table, *, tile_b=512):
    """labels: int array (any shape); emb_table: (num_classes + 1, dim)."""
    orig_shape = labels.shape
    flat = labels.reshape(-1).astype(jnp.int32)
    B = flat.shape[0]
    V, dim = emb_table.shape

    # Small batch -> single grid step, no padded-row writeback.
    # Large batch -> tile_b rows per step (>= 2 steps, feeds both v7x cores).
    Bq = _round_up(max(B, 1), 8)
    tb = Bq if Bq <= tile_b else tile_b
    Bp = _round_up(B, tb)
    # Padded labels = -1: one-hot row is all zeros -> no OOB table read.
    flat = jnp.pad(flat, (0, Bp - B), constant_values=-1)
    flat2d = flat.reshape(Bp, 1)

    itemsize = jnp.dtype(emb_table.dtype).itemsize
    cost = pl.CostEstimate(
        flops=2 * Bp * V * dim,
        transcendentals=0,
        bytes_accessed=(Bp * dim + V * dim) * itemsize + Bp * 4,
    )

    def run(single_buffer_table):
        in_specs, out_specs = _make_specs(V, dim, tb, single_buffer_table)
        return pl.pallas_call(
            label_embed_kernel,
            out_shape=jax.ShapeDtypeStruct((Bp, dim), emb_table.dtype),
            grid_spec=pltpu.PrefetchScalarGridSpec(
                num_scalar_prefetch=0,
                grid=(Bp // tb,),
                in_specs=in_specs,
                out_specs=out_specs,
            ),
            compiler_params=pltpu.CompilerParams(
                dimension_semantics=("parallel",)),
            cost_estimate=cost,
        )(flat2d, emb_table)

    try:
        out = run(True)
    except Exception:
        # Fallback for JAX versions without BlockSpec pipeline_mode / Buffered.
        out = run(False)

    return out[:B].reshape(*orig_shape, dim)


def label_embed_ref(labels, emb_table):
    """Pure-JAX reference mirroring nn.Embedding.forward."""
    return emb_table[labels]


if __name__ == "__main__":
    num_classes, dim, B = 10, 32, 8

    key = jax.random.PRNGKey(0)
    k_emb, k_lab = jax.random.split(key)

    # nn.Embedding(num_classes + 1, dim) default init: N(0, 1).
    emb_table = jax.random.normal(k_emb, (num_classes + 1, dim), jnp.float32)
    labels = jax.random.randint(k_lab, (B,), 0, num_classes + 1, dtype=jnp.int32)

    out = jax.block_until_ready(label_embed(labels, emb_table))
    ref = label_embed_ref(labels, emb_table)

    assert out.shape == (B, dim), out.shape
    assert jnp.allclose(out, ref, atol=1e-6, rtol=1e-6), float(
        jnp.max(jnp.abs(out - ref)))
    print("KERNEL_OK")
</pallas_src>

<mosaic_0001>
module attributes {stable_mosaic.version = 11 : i64} {
  func.func @label_embed_kernel(%arg0: i32, %arg1: memref<8x1xi32, #tpu.memory_space<vmem>>, %arg2: memref<11x32xf32, #tpu.memory_space<vmem>>, %arg3: memref<8x32xf32, #tpu.memory_space<vmem>>) attributes {dimension_semantics = [#tpu.dimension_semantics<parallel>], iteration_bounds = array<i64: 1>, scalar_prefetch = 0 : i64, scratch_operands = 0 : i64, tpu.core_type = #tpu.core_type<tc>, window_params = [{transform_indices = @transform_0, window_bounds = array<i64: 8, 1>}, {pipeline_mode = #tpu.pipeline_mode<synchronous>, transform_indices = @transform_1, window_bounds = array<i64: 11, 32>}, {transform_indices = @transform_2, window_bounds = array<i64: 8, 32>}]} {
    %c0 = arith.constant 0 : index
    %c0_0 = arith.constant 0 : index
    %0 = vector.load %arg1[%c0, %c0_0] : memref<8x1xi32, #tpu.memory_space<vmem>>, vector<8x1xi32>
    %1 = tpu.iota {dimensions = array<i32: 1>} : vector<8x11xi32>
    %2 = vector.broadcast %0 : vector<8x1xi32> to vector<8x11xi32>
    %3 = arith.cmpi eq, %1, %2 : vector<8x11xi32>
    %4 = arith.extui %3 : vector<8x11xi1> to vector<8x11xi32>
    %5 = arith.sitofp %4 : vector<8x11xi32> to vector<8x11xf32>
    %c0_1 = arith.constant 0 : index
    %c0_2 = arith.constant 0 : index
    %6 = vector.load %arg2[%c0_1, %c0_2] : memref<11x32xf32, #tpu.memory_space<vmem>>, vector<11x32xf32>
    %cst = arith.constant dense<0.000000e+00> : vector<8x32xf32>
    %7 = tpu.matmul %5, %6, %cst {dimension_numbers = #tpu.dot_dimension_numbers<[1], [0], [0], [1], [0, 0, 1, 1], [], []>, precision = #tpu.contract_precision<fp32>} : vector<8x11xf32>, vector<11x32xf32>, vector<8x32xf32> -> vector<8x32xf32>
    %c0_3 = arith.constant 0 : index
    %c0_4 = arith.constant 0 : index
    %8 = vector.load %arg3[%c0_3, %c0_4] : memref<8x32xf32, #tpu.memory_space<vmem>>, vector<8x32xf32>
    tpu.vector_store %arg3[%c0_3, %c0_4], %7 {strides = array<i32>} : memref<8x32xf32, #tpu.memory_space<vmem>>, vector<8x32xf32>,
    return
  }
  func.func @transform_0(%arg0: i32) -> (i32, i32) {
    %c0_i32 = arith.constant 0 : i32
    %c0_i32_0 = arith.constant 0 : i32
    return %arg0, %c0_i32 : i32, i32
  }
  func.func @transform_1(%arg0: i32) -> (i32, i32) {
    %c0_i32 = arith.constant 0 : i32
    %c0_i32_0 = arith.constant 0 : i32
    %c0_i32_1 = arith.constant 0 : i32
    return %c0_i32, %c0_i32_0 : i32, i32
  }
  func.func @transform_2(%arg0: i32) -> (i32, i32) {
    %c0_i32 = arith.constant 0 : i32
    %c0_i32_0 = arith.constant 0 : i32
    return %arg0, %c0_i32 : i32, i32
  }
}

module attributes {stable_mosaic.version = 11 : i64} {
  func.func @label_embed_kernel(%arg0: i32, %arg1: memref<8x1xi32, #tpu.memory_space<vmem>>, %arg2: memref<11x32xf32, #tpu.memory_space<vmem>>, %arg3: memref<8x32xf32, #tpu.memory_space<vmem>>) attributes {dimension_semantics = [#tpu.dimension_semantics<parallel>], iteration_bounds = array<i64: 1>, scalar_prefetch = 0 : i64, scratch_operands = 0 : i64, tpu.core_type = #tpu.core_type<tc>, window_params = [{transform_indices = @transform_0, window_bounds = array<i64: 8, 1>}, {pipeline_mode = #tpu.pipeline_mode<synchronous>, transform_indices = @transform_1, window_bounds = array<i64: 11, 32>}, {transform_indices = @transform_2, window_bounds = array<i64: 8, 32>}]} {
    %c0 = arith.constant 0 : index
    %c0_0 = arith.constant 0 : index
    %0 = vector.load %arg1[%c0, %c0_0] : memref<8x1xi32, #tpu.memory_space<vmem>>, vector<8x1xi32>
    %1 = tpu.iota {dimensions = array<i32: 1>} : vector<8x11xi32>
    %2 = vector.broadcast %0 : vector<8x1xi32> to vector<8x11xi32>
    %3 = arith.cmpi eq, %1, %2 : vector<8x11xi32>
    %4 = arith.extui %3 : vector<8x11xi1> to vector<8x11xi32>
    %5 = arith.sitofp %4 : vector<8x11xi32> to vector<8x11xf32>
    %c0_1 = arith.constant 0 : index
    %c0_2 = arith.constant 0 : index
    %6 = vector.load %arg2[%c0_1, %c0_2] : memref<11x32xf32, #tpu.memory_space<vmem>>, vector<11x32xf32>
    %cst = arith.constant dense<0.000000e+00> : vector<8x32xf32>
    %7 = tpu.matmul %5, %6, %cst {dimension_numbers = #tpu.dot_dimension_numbers<[1], [0], [0], [1], [0, 0, 1, 1], [], []>, precision = #tpu.contract_precision<fp32>} : vector<8x11xf32>, vector<11x32xf32>, vector<8x32xf32> -> vector<8x32xf32>
    %c0_3 = arith.constant 0 : index
    %c0_4 = arith.constant 0 : index
    %8 = vector.load %arg3[%c0_3, %c0_4] : memref<8x32xf32, #tpu.memory_space<vmem>>, vector<8x32xf32>
    tpu.vector_store %arg3[%c0_3, %c0_4], %7 {strides = array<i32>} : memref<8x32xf32, #tpu.memory_space<vmem>>, vector<8x32xf32>,
    return
  }
  func.func @transform_0(%arg0: i32) -> (i32, i32) {
    %c0_i32 = arith.constant 0 : i32
    %c0_i32_0 = arith.constant 0 : i32
    return %arg0, %c0_i32 : i32, i32
  }
  func.func @transform_1(%arg0: i32) -> (i32, i32) {
    %c0_i32 = arith.constant 0 : i32
    %c0_i32_0 = arith.constant 0 : i32
    %c0_i32_1 = arith.constant 0 : i32
    return %c0_i32, %c0_i32_0 : i32, i32
  }
  func.func @transform_2(%arg0: i32) -> (i32, i32) {
    %c0_i32 = arith.constant 0 : i32
    %c0_i32_0 = arith.constant 0 : i32
    return %arg0, %c0_i32 : i32, i32
  }
}

</mosaic_0001>

<bundles_post_ra>
// kernel: tpu_custom_call.1
= control target key start
LH: loop header
LB: loop body
LE: loop exit
PB: predicated region body
PF: predicated region fallthrough
CT: control target
= control target key end

     0   :  { %7 = vsyncpa [#allocation3], 0  ;;  %s729_s0 = inlined_call_operand.vmem [shape: s32[8,1], index: 0, kind: input, shape index: {}]   ;;  %s730_s1 = inlined_call_operand.hbm [shape: f32[11,32], index: 1, kind: input, shape index: {}]   ;;  %s731_s2 = inlined_call_operand.hbm [shape: f32[8,32], index: 2, kind: output, shape index: {}]  }
   0x1   :  { %8 = vsyncpa [#allocation4], 0  ;;  %s669_s9 = smov [#allocation2]   ;;  %s621_s13 = scalar_lea.hbm %s730_s1, 256 }
   0x2   :  { %s16_s10 = sshll.u32 %s669_s9, 4  ;;  %p622_p0 = scmp.ne.s32.totalorder %s730_s1, %s621_s13  ;;  %s17_s10 = int_to_ptr.vmem [resolvable:$true] %s16_s10 }
   0x3   :  { %p625_p1 = scmp.lt.u32.totalorder %s621_s13, %s730_s1 }
   0x5   :  { %p627_p2 = pnand %p625_p1, %p622_p0 }
   0x7   :  { %630 = shalt.err (!%p627_p2)
}
   0x8   :  { %s631_s18 = scalar_lea.vmem %s17_s10, 256  ;;  %p636_p4 = scmp.lt.s32.totalorder %s17_s10, %s17_s10 }
   0x9   :  { %p632_p3 = scmp.ne.s32.totalorder %s17_s10, %s631_s18  ;;  %p637_p5 = scmp.lt.s32.totalorder %s631_s18, %s631_s18 }
   0xb   :  { %p638_p6 = por %p637_p5, %p636_p4 }
   0xd   :  { %p639_p7 = pnand %p638_p6, %p632_p3 }
   0xf   :  { %642 = shalt.err (!%p639_p7)
}
  0x10   :  { %s670_s19 = smov 128   ;;  %s671_s20 = smov 8  }
  0x11   :  { %22 = dma.hbm_to_vmem [thread:$0]  %s730_s1, 256, %s17_s10, [#allocation3], %s670_s19, %s670_s19, %s671_s20  }
  0x12   :  { %665 = dma.done.wait [#allocation3], 256  }
  0x13   :  { %666 = vsyncadd [#allocation3], 4294967040  ;;  %v672_v0 = vmov 0   ;;  %vm41_vm0 = vcmask 1042432   ;;  %v26_v1 = vld [vmem:[%s729_s0] sm:$0xff]  ;;  %v673_v7 = vmov 0.0|0.0   ;;  %v27_v21 = vlaneseq }
  0x14   :  { %620 = vset.pattern.permute.xlu0 %v672_v0  ;;  %v35_v2 = vld [vmem:[#allocation2] sm:$0xff]  ;;  %v36_v3 = vld [vmem:[#allocation2 + $0x8] sm:$0x7]  ;;  %594 = vmatprep.subr.bf16.mxu0 %v673_v7  ;;  %vm674_vm1 = vmmov 0   ;;  %v675_v11 = vmov 0.0   ;;  %vm37_vm2 = vcmask 89088  }
  0x15   :  { %30 = vperm.xlu0 %620, %v26_v1   ;;  %v43_v4 = vsel %vm41_vm0, %v36_v3, 0  ;;  %v46_v5 = vand.u32 4294901760, %v35_v2  ;;  %585 = vmatprep.subr.bf16.mxu1 %v673_v7  ;;  %v28_v22 = vand.u32 127, %v27_v21  ;;  %s676_s0 = smov [#allocation5]   ;;  %vm504_vm4 = vcmask 261120  }
  0x16   :  { %v49_v6 = vand.u32 4294901760, %v43_v4  ;;  %568 = vmatprep.mubr.msk.f32.mxu0 %vm674_vm1, %v675_v11  ;;  %547 = vmatprep.mubr.msk.f32.mxu1 %vm674_vm1, %v675_v11  ;;  %s512_s1 = sshll.u32 %s676_s0, 4  ;;  %s513_s1 = int_to_ptr.vmem [resolvable:$true] %s512_s1 }
  0x17   :  { %v124_v9 = vsub.f32 %v35_v2, %v46_v5  ;;  %s643_s25 = scalar_lea.vmem %s513_s1, 128  ;;  %p648_p9 = scmp.lt.s32.totalorder %s513_s1, %s513_s1 }
  0x18   :  { %v586_v8 = vpack.c.bf16 %v49_v6, %v46_v5  ;;  %v131_v10 = vsub.f32 %v43_v4, %v49_v6  ;;  %p644_p8 = scmp.ne.s32.totalorder %s513_s1, %s643_s25  ;;  %p649_p10 = scmp.lt.s32.totalorder %s643_s25, %s643_s25 }
  0x19   :  { %v125_v12 = vand.u32 4294901760, %v124_v9 }
  0x1a   :  { %596 = vmatpush3.bf16.msra.mxu0 %v586_v8  ;;  %587 = vmatpush3.bf16.msra.mxu1 %v586_v8  ;;  %v132_v13 = vand.u32 4294901760, %v131_v10  ;;  %v592_v20 = vpack.c.bf16 %v131_v10, %v124_v9  ;;  %p650_p11 = por %p649_p10, %p648_p9 }
  0x1b   :  { %588 = vmatprep.subr.bf16.mxu1 %v673_v7  ;;  %597 = vmatprep.subr.bf16.mxu0 %v673_v7  ;;  %v126_v14 = vsub.f32 %v124_v9, %v125_v12 }
  0x1c   :  { %v133_v15 = vsub.f32 %v131_v10, %v132_v13  ;;  %v598_v16 = vpack.c.bf16 %v132_v13, %v125_v12  ;;  %p651_p12 = pnand %p650_p11, %p644_p8 }
  0x1d   :  { %v127_v17 = vand.u32 4294901760, %v126_v14 }
  0x1e   :  { %v134_v18 = vand.u32 4294901760, %v133_v15 }
  0x20   :  { %v589_v19 = vpack.c.bf16 %v134_v18, %v127_v17 }
  0x94   :  { %v31_v23 = vpop.permute.xlu0 %30 }
  0x95   :  { %vm32_vm3 = vcmp.eq.s32.totalorder %v28_v22, %v31_v23 }
  0x96   :  { %v521_v24 = vsel %vm32_vm3, 1.0, %v675_v11 }
  0x97   :  { %v39_v25 = vsel %vm37_vm2, %v521_v24, 0 }
  0x98   :  { %v113_v26 = vsub.f32 %v39_v25, %v39_v25 }
  0x9a   :  { %v114_v27 = vand.u32 4294901760, %v113_v26 }
  0x9c   :  { %569 = vmatmul.mubr.f32.vlgmr.msra.gmra.mrb[0].mxu0 %v114_v27  ;;  %v115_v28 = vsub.f32 %v113_v26, %v114_v27 }
  0x9d   :  { %599 = vmatpush3.bf16.msra.mxu0 %v598_v16  ;;  %575 = vmatprep.mubr.msk.f32.mxu0 %vm674_vm1, %v675_v11 }
  0x9e   :  { %v116_v29 = vand.u32 4294901760, %v115_v28  ;;  %600 = vmatprep.subr.bf16.mxu0 %v673_v7 }
  0xa0   :  { %548 = vmatmul.mubr.f32.vlgmr.msra.gmra.mrb[0].mxu1 %v116_v29 }
  0xa1   :  { %590 = vmatpush3.bf16.msra.mxu1 %v589_v19  ;;  %554 = vmatprep.mubr.msk.f32.mxu1 %vm674_vm1, %v675_v11 }
  0xa2   :  { %591 = vmatprep.subr.bf16.mxu1 %v673_v7 }
  0xa4   :  { %576 = vmatmul.mubr.msk.f32.vlgmr.msra.gmra.mrb[0].mxu0 %vm37_vm2, %v521_v24 }
  0xa5   :  { %602 = vmatpush3.bf16.msra.mxu0 %v586_v8  ;;  %582 = vmatprep.mubr.msk.f32.mxu0 %vm674_vm1, %v675_v11 }
  0xa8   :  { %555 = vmatmul.mubr.msk.f32.vlgmr.msra.gmra.mrb[0].mxu1 %vm37_vm2, %v521_v24 }
  0xa9   :  { %593 = vmatpush3.bf16.msra.mxu1 %v592_v20  ;;  %561 = vmatprep.mubr.msk.f32.mxu1 %vm674_vm1, %v675_v11 }
  0xac   :  { %583 = vmatmul.mubr.msk.f32.vlgmr.msra.gmra.mrb[0].mxu0 %vm37_vm2, %v521_v24 }
  0xb0   :  { %562 = vmatmul.mubr.f32.vlgmr.msra.gmra.mrb[0].mxu1 %v113_v26 }
 0x17f   :  { %v500_v30 = vpop.f32.mrb[0].mxu0 }
 0x180   :  { %v584_v31 = vpop.f32.mrb[1].mxu0 }
 0x183   :  { %v275_v32 = vpop.f32.mrb[0].mxu1 }
 0x184   :  { %v603_v33 = vadd.f32 %v500_v30, %v275_v32  ;;  %v563_v34 = vpop.f32.mrb[1].mxu1 }
 0x186   :  { %505 = vst.msk [vmem:[#allocation5] sm:$0xff] %vm504_vm4, %v603_v33 }
 0x187   :  { %654 = shalt.err (!%p651_p12)
}
 0x188   :  { %s655_s28 = scalar_lea.hbm %s731_s2, 128 }
 0x189   :  { %p656_p13 = scmp.ne.s32.totalorder %s731_s2, %s655_s28  ;;  %p659_p0 = scmp.lt.u32.totalorder %s655_s28, %s731_s2 }
 0x18b   :  { %p661_p1 = pnand %p659_p0, %p656_p13 }
 0x18d   :  { %664 = shalt.err (!%p661_p1)
}
 0x18e   :  { %515 = dma.vmem_to_hbm [thread:$0]  %s513_s1, 128, %s731_s2, [#allocation4]  }
 0x18f   :  { %667 = dma.done.wait [#allocation4], 128  }
 0x190   :  { %668 = vsyncadd [#allocation4], 4294967168 }
 0x191   :  { %519 = vsyncpa [#allocation3], 1 }
 0x192   :  { %520 = vsyncpa [#allocation4], 1 }

// kernel: tpu_custom_call.1
= control target key start
LH: loop header
LB: loop body
LE: loop exit
PB: predicated region body
PF: predicated region fallthrough
CT: control target
= control target key end

     0   :  { %7 = vsyncpa [#allocation3], 0  ;;  %s729_s0 = inlined_call_operand.vmem [shape: s32[8,1], index: 0, kind: input, shape index: {}]   ;;  %s730_s1 = inlined_call_operand.hbm [shape: f32[11,32], index: 1, kind: input, shape index: {}]   ;;  %s731_s2 = inlined_call_operand.hbm [shape: f32[8,32], index: 2, kind: output, shape index: {}]  }
   0x1   :  { %8 = vsyncpa [#allocation4], 0  ;;  %s669_s9 = smov [#allocation2]   ;;  %s621_s13 = scalar_lea.hbm %s730_s1, 256 }
   0x2   :  { %s16_s10 = sshll.u32 %s669_s9, 4  ;;  %p622_p0 = scmp.ne.s32.totalorder %s730_s1, %s621_s13  ;;  %s17_s10 = int_to_ptr.vmem [resolvable:$true] %s16_s10 }
   0x3   :  { %p625_p1 = scmp.lt.u32.totalorder %s621_s13, %s730_s1 }
   0x5   :  { %p627_p2 = pnand %p625_p1, %p622_p0 }
   0x7   :  { %630 = shalt.err (!%p627_p2)
}
   0x8   :  { %s631_s18 = scalar_lea.vmem %s17_s10, 256  ;;  %p636_p4 = scmp.lt.s32.totalorder %s17_s10, %s17_s10 }
   0x9   :  { %p632_p3 = scmp.ne.s32.totalorder %s17_s10, %s631_s18  ;;  %p637_p5 = scmp.lt.s32.totalorder %s631_s18, %s631_s18 }
   0xb   :  { %p638_p6 = por %p637_p5, %p636_p4 }
   0xd   :  { %p639_p7 = pnand %p638_p6, %p632_p3 }
   0xf   :  { %642 = shalt.err (!%p639_p7)
}
  0x10   :  { %s670_s19 = smov 128   ;;  %s671_s20 = smov 8  }
  0x11   :  { %22 = dma.hbm_to_vmem [thread:$0]  %s730_s1, 256, %s17_s10, [#allocation3], %s670_s19, %s670_s19, %s671_s20  }
  0x12   :  { %665 = dma.done.wait [#allocation3], 256  }
  0x13   :  { %666 = vsyncadd [#allocation3], 4294967040  ;;  %v672_v0 = vmov 0   ;;  %vm41_vm0 = vcmask 1042432   ;;  %v26_v1 = vld [vmem:[%s729_s0] sm:$0xff]  ;;  %v673_v7 = vmov 0.0|0.0   ;;  %v27_v21 = vlaneseq }
  0x14   :  { %620 = vset.pattern.permute.xlu0 %v672_v0  ;;  %v35_v2 = vld [vmem:[#allocation2] sm:$0xff]  ;;  %v36_v3 = vld [vmem:[#allocation2 + $0x8] sm:$0x7]  ;;  %594 = vmatprep.subr.bf16.mxu0 %v673_v7  ;;  %vm674_vm1 = vmmov 0   ;;  %v675_v11 = vmov 0.0   ;;  %vm37_vm2 = vcmask 89088  }
  0x15   :  { %30 = vperm.xlu0 %620, %v26_v1   ;;  %v43_v4 = vsel %vm41_vm0, %v36_v3, 0  ;;  %v46_v5 = vand.u32 4294901760, %v35_v2  ;;  %585 = vmatprep.subr.bf16.mxu1 %v673_v7  ;;  %v28_v22 = vand.u32 127, %v27_v21  ;;  %s676_s0 = smov [#allocation5]   ;;  %vm504_vm4 = vcmask 261120  }
  0x16   :  { %v49_v6 = vand.u32 4294901760, %v43_v4  ;;  %568 = vmatprep.mubr.msk.f32.mxu0 %vm674_vm1, %v675_v11  ;;  %547 = vmatprep.mubr.msk.f32.mxu1 %vm674_vm1, %v675_v11  ;;  %s512_s1 = sshll.u32 %s676_s0, 4  ;;  %s513_s1 = int_to_ptr.vmem [resolvable:$true] %s512_s1 }
  0x17   :  { %v124_v9 = vsub.f32 %v35_v2, %v46_v5  ;;  %s643_s25 = scalar_lea.vmem %s513_s1, 128  ;;  %p648_p9 = scmp.lt.s32.totalorder %s513_s1, %s513_s1 }
  0x18   :  { %v586_v8 = vpack.c.bf16 %v49_v6, %v46_v5  ;;  %v131_v10 = vsub.f32 %v43_v4, %v49_v6  ;;  %p644_p8 = scmp.ne.s32.totalorder %s513_s1, %s643_s25  ;;  %p649_p10 = scmp.lt.s32.totalorder %s643_s25, %s643_s25 }
  0x19   :  { %v125_v12 = vand.u32 4294901760, %v124_v9 }
  0x1a   :  { %596 = vmatpush3.bf16.msra.mxu0 %v586_v8  ;;  %587 = vmatpush3.bf16.msra.mxu1 %v586_v8  ;;  %v132_v13 = vand.u32 4294901760, %v131_v10  ;;  %v592_v20 = vpack.c.bf16 %v131_v10, %v124_v9  ;;  %p650_p11 = por %p649_p10, %p648_p9 }
  0x1b   :  { %588 = vmatprep.subr.bf16.mxu1 %v673_v7  ;;  %597 = vmatprep.subr.bf16.mxu0 %v673_v7  ;;  %v126_v14 = vsub.f32 %v124_v9, %v125_v12 }
  0x1c   :  { %v133_v15 = vsub.f32 %v131_v10, %v132_v13  ;;  %v598_v16 = vpack.c.bf16 %v132_v13, %v125_v12  ;;  %p651_p12 = pnand %p650_p11, %p644_p8 }
  0x1d   :  { %v127_v17 = vand.u32 4294901760, %v126_v14 }
  0x1e   :  { %v134_v18 = vand.u32 4294901760, %v133_v15 }
  0x20   :  { %v589_v19 = vpack.c.bf16 %v134_v18, %v127_v17 }
  0x94   :  { %v31_v23 = vpop.permute.xlu0 %30 }
  0x95   :  { %vm32_vm3 = vcmp.eq.s32.totalorder %v28_v22, %v31_v23 }
  0x96   :  { %v521_v24 = vsel %vm32_vm3, 1.0, %v675_v11 }
  0x97   :  { %v39_v25 = vsel %vm37_vm2, %v521_v24, 0 }
  0x98   :  { %v113_v26 = vsub.f32 %v39_v25, %v39_v25 }
  0x9a   :  { %v114_v27 = vand.u32 4294901760, %v113_v26 }
  0x9c   :  { %569 = vmatmul.mubr.f32.vlgmr.msra.gmra.mrb[0].mxu0 %v114_v27  ;;  %v115_v28 = vsub.f32 %v113_v26, %v114_v27 }
  0x9d   :  { %599 = vmatpush3.bf16.msra.mxu0 %v598_v16  ;;  %575 = vmatprep.mubr.msk.f32.mxu0 %vm674_vm1, %v675_v11 }
  0x9e   :  { %v116_v29 = vand.u32 4294901760, %v115_v28  ;;  %600 = vmatprep.subr.bf16.mxu0 %v673_v7 }
  0xa0   :  { %548 = vmatmul.mubr.f32.vlgmr.msra.gmra.mrb[0].mxu1 %v116_v29 }
  0xa1   :  { %590 = vmatpush3.bf16.msra.mxu1 %v589_v19  ;;  %554 = vmatprep.mubr.msk.f32.mxu1 %vm674_vm1, %v675_v11 }
  0xa2   :  { %591 = vmatprep.subr.bf16.mxu1 %v673_v7 }
  0xa4   :  { %576 = vmatmul.mubr.msk.f32.vlgmr.msra.gmra.mrb[0].mxu0 %vm37_vm2, %v521_v24 }
  0xa5   :  { %602 = vmatpush3.bf16.msra.mxu0 %v586_v8  ;;  %582 = vmatprep.mubr.msk.f32.mxu0 %vm674_vm1, %v675_v11 }
  0xa8   :  { %555 = vmatmul.mubr.msk.f32.vlgmr.msra.gmra.mrb[0].mxu1 %vm37_vm2, %v521_v24 }
  0xa9   :  { %593 = vmatpush3.bf16.msra.mxu1 %v592_v20  ;;  %561 = vmatprep.mubr.msk.f32.mxu1 %vm674_vm1, %v675_v11 }
  0xac   :  { %583 = vmatmul.mubr.msk.f32.vlgmr.msra.gmra.mrb[0].mxu0 %vm37_vm2, %v521_v24 }
  0xb0   :  { %562 = vmatmul.mubr.f32.vlgmr.msra.gmra.mrb[0].mxu1 %v113_v26 }
 0x17f   :  { %v500_v30 = vpop.f32.mrb[0].mxu0 }
 0x180   :  { %v584_v31 = vpop.f32.mrb[1].mxu0 }
 0x183   :  { %v275_v32 = vpop.f32.mrb[0].mxu1 }
 0x184   :  { %v603_v33 = vadd.f32 %v500_v30, %v275_v32  ;;  %v563_v34 = vpop.f32.mrb[1].mxu1 }
 0x186   :  { %505 = vst.msk [vmem:[#allocation5] sm:$0xff] %vm504_vm4, %v603_v33 }
 0x187   :  { %654 = shalt.err (!%p651_p12)
}
 0x188   :  { %s655_s28 = scalar_lea.hbm %s731_s2, 128 }
 0x189   :  { %p656_p13 = scmp.ne.s32.totalorder %s731_s2, %s655_s28  ;;  %p659_p0 = scmp.lt.u32.totalorder %s655_s28, %s731_s2 }
 0x18b   :  { %p661_p1 = pnand %p659_p0, %p656_p13 }
 0x18d   :  { %664 = shalt.err (!%p661_p1)
}
 0x18e   :  { %515 = dma.vmem_to_hbm [thread:$0]  %s513_s1, 128, %s731_s2, [#allocation4]  }
 0x18f   :  { %667 = dma.done.wait [#allocation4], 128  }
 0x190   :  { %668 = vsyncadd [#allocation4], 4294967168 }
 0x191   :  { %519 = vsyncpa [#allocation3], 1 }
 0x192   :  { %520 = vsyncpa [#allocation4], 1 }

</bundles_post_ra>
